<compile_context>
chip_gen: v6e
topology: v6e:2x2x1
jax: 0.10.0
libtpu: 0.0.40
codegen_flags: <defaults>
</compile_context>

<pallas_src>
import jax
import jax.numpy as jnp
from jax.experimental import pallas as pl
from jax.experimental.pallas import tpu as pltpu

HIDDEN = 256
LANE = 128
SUBLANE = 8


def _round_up(x, m):
    return (x + m - 1) // m * m


def qnet_kernel(x_ref, w1_ref, b1_ref, w2_ref, b2_ref, w3_ref, b3_ref, o_ref):
    # One batch tile per grid step. Weights/biases map to the same block every step, so
    # they remain VMEM-resident. bf16 operands -> MXU, f32 accumulation/bias/ReLU -> VPU.
    x = x_ref[...]                                                                   # (TB, D) bf16
    h1 = jnp.dot(x, w1_ref[...], preferred_element_type=jnp.float32) + b1_ref[...]
    h1 = jnp.maximum(h1, 0.0).astype(jnp.bfloat16)                                   # (TB, 256)
    h2 = jnp.dot(h1, w2_ref[...], preferred_element_type=jnp.float32) + b2_ref[...]
    h2 = jnp.maximum(h2, 0.0).astype(jnp.bfloat16)                                   # (TB, 256)
    out = jnp.dot(h2, w3_ref[...], preferred_element_type=jnp.float32) + b3_ref[...]
    o_ref[...] = out.astype(o_ref.dtype)                                             # lane-dense vst


def marl_qnetwork_forward(x, params, block_batch=512):
    """x: (B, input_dim) float. params: dict of w1,b1,w2,b2,w3,b3 (f32).
    Returns (B, n_actions) f32, matching the PyTorch forward."""
    B, D = x.shape
    n_actions = params["w3"].shape[1]
    n_out = _round_up(max(n_actions, LANE), LANE)  # lane-dense output slab (>=128, mult of 128)

    # bf16 matmul operands (f32 accumulation happens in-kernel); biases stay f32.
    xb = x.astype(jnp.bfloat16)
    w1 = params["w1"].astype(jnp.bfloat16)
    w2 = params["w2"].astype(jnp.bfloat16)
    w3 = jnp.zeros((HIDDEN, n_out), jnp.bfloat16).at[:, :n_actions].set(
        params["w3"].astype(jnp.bfloat16))
    b1 = params["b1"].reshape(1, HIDDEN).astype(jnp.float32)
    b2 = params["b2"].reshape(1, HIDDEN).astype(jnp.float32)
    b3 = jnp.zeros((1, n_out), jnp.float32).at[:, :n_actions].set(
        params["b3"].reshape(1, n_actions).astype(jnp.float32))

    # Batch tile: multiple of 8 sublanes, up to block_batch rows per grid step.
    tb = min(block_batch, _round_up(B, SUBLANE))
    b_pad = _round_up(B, tb)
    if b_pad != B:
        xb = jnp.pad(xb, ((0, b_pad - B), (0, 0)))
    grid = (b_pad // tb,)

    flops = 2 * b_pad * (D * HIDDEN + HIDDEN * HIDDEN + HIDDEN * n_out)
    bytes_accessed = (xb.size * 2 + w1.size * 2 + w2.size * 2 + w3.size * 2
                      + (b1.size + b2.size + b3.size) * 4 + b_pad * n_out * 4)

    out = pl.pallas_call(
        qnet_kernel,
        out_shape=jax.ShapeDtypeStruct((b_pad, n_out), jnp.float32),
        grid_spec=pltpu.PrefetchScalarGridSpec(
            num_scalar_prefetch=0,
            grid=grid,
            in_specs=[
                pl.BlockSpec((tb, D), lambda i: (i, 0)),           # x: streamed per batch tile
                pl.BlockSpec((D, HIDDEN), lambda i: (0, 0)),       # weights/biases: fetched once,
                pl.BlockSpec((1, HIDDEN), lambda i: (0, 0)),       # VMEM-resident across the grid
                pl.BlockSpec((HIDDEN, HIDDEN), lambda i: (0, 0)),
                pl.BlockSpec((1, HIDDEN), lambda i: (0, 0)),
                pl.BlockSpec((HIDDEN, n_out), lambda i: (0, 0)),
                pl.BlockSpec((1, n_out), lambda i: (0, 0)),
            ],
            out_specs=pl.BlockSpec((tb, n_out), lambda i: (i, 0)),
        ),
        compiler_params=pltpu.CompilerParams(
            dimension_semantics=("parallel",)),     # batch tiles shard across v7x's 2 TCs
        cost_estimate=pl.CostEstimate(
            flops=flops, transcendentals=0, bytes_accessed=bytes_accessed),
    )(xb, w1, b1, w2, b2, w3, b3)

    return out[:B, :n_actions]


def init_params(key, input_dim, n_actions, hidden=HIDDEN):
    """Mimics PyTorch nn.Linear default init: U[-1/sqrt(fan_in), +1/sqrt(fan_in)]."""
    ks = jax.random.split(key, 6)

    def linear(kw, kb, fan_in, fan_out):
        bound = 1.0 / jnp.sqrt(fan_in)
        w = jax.random.uniform(kw, (fan_in, fan_out), jnp.float32, -bound, bound)
        b = jax.random.uniform(kb, (1, fan_out), jnp.float32, -bound, bound)
        return w, b

    w1, b1 = linear(ks[0], ks[1], input_dim, hidden)
    w2, b2 = linear(ks[2], ks[3], hidden, hidden)
    w3, b3 = linear(ks[4], ks[5], hidden, n_actions)
    return {"w1": w1, "b1": b1, "w2": w2, "b2": b2, "w3": w3, "b3": b3}


def reference_forward(x, p):
    h1 = jnp.maximum(x @ p["w1"] + p["b1"], 0.0)
    h2 = jnp.maximum(h1 @ p["w2"] + p["b2"], 0.0)
    return h2 @ p["w3"] + p["b3"]


if __name__ == "__main__":
    key = jax.random.PRNGKey(0)
    k_param, k_x1, k_x2 = jax.random.split(key, 3)

    input_dim, n_actions = 32, 8
    params = init_params(k_param, input_dim, n_actions)

    # Small single-tile batch (typical online MARL inference path).
    batch = 8
    x = jax.random.normal(k_x1, (batch, input_dim), jnp.float32)
    out = jax.block_until_ready(marl_qnetwork_forward(x, params))
    ref = reference_forward(x, params)
    assert out.shape == (batch, n_actions)
    # bf16 operands with f32 accumulation: loosen tolerance vs the pure-f32 reference.
    assert jnp.allclose(out, ref, atol=5e-2, rtol=5e-2)

    # Multi-tile, non-tile-aligned batch: exercises the grid, batch padding and the
    # resident-weight path (weights fetched once, reused across tiles).
    batch2 = 600
    x2 = jax.random.normal(k_x2, (batch2, input_dim), jnp.float32)
    out2 = jax.block_until_ready(marl_qnetwork_forward(x2, params))
    ref2 = reference_forward(x2, params)
    assert out2.shape == (batch2, n_actions)
    assert jnp.allclose(out2, ref2, atol=5e-2, rtol=5e-2)

    print("KERNEL_OK")
</pallas_src>

<mosaic_0001>
module attributes {stable_mosaic.version = 11 : i64} {
  func.func @qnet_kernel(%arg0: i32, %arg1: memref<8x32xbf16, #tpu.memory_space<vmem>>, %arg2: memref<32x256xbf16, #tpu.memory_space<vmem>>, %arg3: memref<1x256xf32, #tpu.memory_space<vmem>>, %arg4: memref<256x256xbf16, #tpu.memory_space<vmem>>, %arg5: memref<1x256xf32, #tpu.memory_space<vmem>>, %arg6: memref<256x128xbf16, #tpu.memory_space<vmem>>, %arg7: memref<1x128xf32, #tpu.memory_space<vmem>>, %arg8: memref<8x128xf32, #tpu.memory_space<vmem>>) attributes {dimension_semantics = [#tpu.dimension_semantics<parallel>], iteration_bounds = array<i64: 1>, scalar_prefetch = 0 : i64, scratch_operands = 0 : i64, tpu.core_type = #tpu.core_type<tc>, window_params = [{transform_indices = @transform_0, window_bounds = array<i64: 8, 32>}, {pipeline_mode = #tpu.pipeline_mode<synchronous>, transform_indices = @transform_1, window_bounds = array<i64: 32, 256>}, {pipeline_mode = #tpu.pipeline_mode<synchronous>, transform_indices = @transform_2, window_bounds = array<i64: 1, 256>}, {pipeline_mode = #tpu.pipeline_mode<synchronous>, transform_indices = @transform_3, window_bounds = array<i64: 256, 256>}, {pipeline_mode = #tpu.pipeline_mode<synchronous>, transform_indices = @transform_4, window_bounds = array<i64: 1, 256>}, {pipeline_mode = #tpu.pipeline_mode<synchronous>, transform_indices = @transform_5, window_bounds = array<i64: 256, 128>}, {pipeline_mode = #tpu.pipeline_mode<synchronous>, transform_indices = @transform_6, window_bounds = array<i64: 1, 128>}, {transform_indices = @transform_7, window_bounds = array<i64: 8, 128>}]} {
    %c0 = arith.constant 0 : index
    %c0_0 = arith.constant 0 : index
    %0 = vector.load %arg1[%c0, %c0_0] : memref<8x32xbf16, #tpu.memory_space<vmem>>, vector<8x32xbf16>
    %c0_1 = arith.constant 0 : index
    %c0_2 = arith.constant 0 : index
    %1 = vector.load %arg2[%c0_1, %c0_2] : memref<32x256xbf16, #tpu.memory_space<vmem>>, vector<32x256xbf16>
    %cst = arith.constant dense<0.000000e+00> : vector<8x256xf32>
    %2 = tpu.matmul %0, %1, %cst {dimension_numbers = #tpu.dot_dimension_numbers<[1], [0], [0], [1], [0, 0, 1, 1], [], []>} : vector<8x32xbf16>, vector<32x256xbf16>, vector<8x256xf32> -> vector<8x256xf32>
    %c0_3 = arith.constant 0 : index
    %c0_4 = arith.constant 0 : index
    %3 = vector.load %arg3[%c0_3, %c0_4] : memref<1x256xf32, #tpu.memory_space<vmem>>, vector<1x256xf32>
    %4 = vector.broadcast %3 : vector<1x256xf32> to vector<8x256xf32>
    %5 = arith.addf %2, %4 : vector<8x256xf32>
    %cst_5 = arith.constant 0.000000e+00 : f32
    %6 = vector.broadcast %cst_5 : f32 to vector<8x256xf32>
    %7 = arith.maximumf %5, %6 : vector<8x256xf32>
    %8 = arith.truncf %7 : vector<8x256xf32> to vector<8x256xbf16>
    %c0_6 = arith.constant 0 : index
    %c0_7 = arith.constant 0 : index
    %9 = vector.load %arg4[%c0_6, %c0_7] : memref<256x256xbf16, #tpu.memory_space<vmem>>, vector<256x256xbf16>
    %cst_8 = arith.constant dense<0.000000e+00> : vector<8x256xf32>
    %10 = tpu.matmul %8, %9, %cst_8 {dimension_numbers = #tpu.dot_dimension_numbers<[1], [0], [0], [1], [0, 0, 1, 1], [], []>} : vector<8x256xbf16>, vector<256x256xbf16>, vector<8x256xf32> -> vector<8x256xf32>
    %c0_9 = arith.constant 0 : index
    %c0_10 = arith.constant 0 : index
    %11 = vector.load %arg5[%c0_9, %c0_10] : memref<1x256xf32, #tpu.memory_space<vmem>>, vector<1x256xf32>
    %12 = vector.broadcast %11 : vector<1x256xf32> to vector<8x256xf32>
    %13 = arith.addf %10, %12 : vector<8x256xf32>
    %cst_11 = arith.constant 0.000000e+00 : f32
    %14 = vector.broadcast %cst_11 : f32 to vector<8x256xf32>
    %15 = arith.maximumf %13, %14 : vector<8x256xf32>
    %16 = arith.truncf %15 : vector<8x256xf32> to vector<8x256xbf16>
    %c0_12 = arith.constant 0 : index
    %c0_13 = arith.constant 0 : index
    %17 = vector.load %arg6[%c0_12, %c0_13] : memref<256x128xbf16, #tpu.memory_space<vmem>>, vector<256x128xbf16>
    %cst_14 = arith.constant dense<0.000000e+00> : vector<8x128xf32>
    %18 = tpu.matmul %16, %17, %cst_14 {dimension_numbers = #tpu.dot_dimension_numbers<[1], [0], [0], [1], [0, 0, 1, 1], [], []>} : vector<8x256xbf16>, vector<256x128xbf16>, vector<8x128xf32> -> vector<8x128xf32>
    %c0_15 = arith.constant 0 : index
    %c0_16 = arith.constant 0 : index
    %19 = vector.load %arg7[%c0_15, %c0_16] : memref<1x128xf32, #tpu.memory_space<vmem>>, vector<1x128xf32>
    %20 = vector.broadcast %19 : vector<1x128xf32> to vector<8x128xf32>
    %21 = arith.addf %18, %20 : vector<8x128xf32>
    %c0_17 = arith.constant 0 : index
    %c0_18 = arith.constant 0 : index
    %22 = vector.load %arg8[%c0_17, %c0_18] : memref<8x128xf32, #tpu.memory_space<vmem>>, vector<8x128xf32>
    tpu.vector_store %arg8[%c0_17, %c0_18], %21 {strides = array<i32>} : memref<8x128xf32, #tpu.memory_space<vmem>>, vector<8x128xf32>,
    return
  }
  func.func @transform_0(%arg0: i32) -> (i32, i32) {
    %c0_i32 = arith.constant 0 : i32
    %c0_i32_0 = arith.constant 0 : i32
    return %arg0, %c0_i32 : i32, i32
  }
  func.func @transform_1(%arg0: i32) -> (i32, i32) {
    %c0_i32 = arith.constant 0 : i32
    %c0_i32_0 = arith.constant 0 : i32
    %c0_i32_1 = arith.constant 0 : i32
    return %c0_i32, %c0_i32_0 : i32, i32
  }
  func.func @transform_2(%arg0: i32) -> (i32, i32) {
    %c0_i32 = arith.constant 0 : i32
    %c0_i32_0 = arith.constant 0 : i32
    %c0_i32_1 = arith.constant 0 : i32
    return %c0_i32, %c0_i32_0 : i32, i32
  }
  func.func @transform_3(%arg0: i32) -> (i32, i32) {
    %c0_i32 = arith.constant 0 : i32
    %c0_i32_0 = arith.constant 0 : i32
    %c0_i32_1 = arith.constant 0 : i32
    return %c0_i32, %c0_i32_0 : i32, i32
  }
  func.func @transform_4(%arg0: i32) -> (i32, i32) {
    %c0_i32 = arith.constant 0 : i32
    %c0_i32_0 = arith.constant 0 : i32
    %c0_i32_1 = arith.constant 0 : i32
    return %c0_i32, %c0_i32_0 : i32, i32
  }
  func.func @transform_5(%arg0: i32) -> (i32, i32) {
    %c0_i32 = arith.constant 0 : i32
    %c0_i32_0 = arith.constant 0 : i32
    %c0_i32_1 = arith.constant 0 : i32
    return %c0_i32, %c0_i32_0 : i32, i32
  }
  func.func @transform_6(%arg0: i32) -> (i32, i32) {
    %c0_i32 = arith.constant 0 : i32
    %c0_i32_0 = arith.constant 0 : i32
    %c0_i32_1 = arith.constant 0 : i32
    return %c0_i32, %c0_i32_0 : i32, i32
  }
  func.func @transform_7(%arg0: i32) -> (i32, i32) {
    %c0_i32 = arith.constant 0 : i32
    %c0_i32_0 = arith.constant 0 : i32
    return %arg0, %c0_i32 : i32, i32
  }
}

</mosaic_0001>

<bundles_post_ra>
// kernel: tpu_custom_call.1
= control target key start
LH: loop header
LB: loop body
LE: loop exit
PB: predicated region body
PF: predicated region fallthrough
CT: control target
= control target key end

     0   :  { %12 = vsyncpa [#allocation3], 0  ;;  %s947_s0 = inlined_call_operand.hbm [shape: bf16[8,32], index: 0, kind: input, shape index: {}]   ;;  %s948_s1 = inlined_call_operand.hbm [shape: bf16[32,256], index: 1, kind: input, shape index: {}]   ;;  %s949_s2 = inlined_call_operand.vmem [shape: f32[1,256], index: 2, kind: input, shape index: {}]   ;;  %s950_s3 = inlined_call_operand.hbm [shape: bf16[256,256], index: 3, kind: input, shape index: {}]   ;;  %s951_s4 = inlined_call_operand.vmem [shape: f32[1,256], index: 4, kind: input, shape index: {}]   ;;  %s952_s5 = inlined_call_operand.hbm [shape: bf16[256,128], index: 5, kind: input, shape index: {}]   ;;  %s953_s6 = inlined_call_operand.vmem [shape: f32[1,128], index: 6, kind: input, shape index: {}]   ;;  %s954_s7 = inlined_call_operand.hbm [shape: f32[8,128], index: 7, kind: output, shape index: {}]  }
   0x1   :  { %13 = vsyncpa [#allocation6], 0 }
   0x2   :  { %14 = vsyncpa [#allocation9], 0 }
   0x3   :  { %15 = vsyncpa [#allocation4], 0  ;;  %s873_s24 = smov [#allocation5]  }
   0x4   :  { %s31_s25 = sshll.u32 %s873_s24, 4  ;;  %s32_s25 = int_to_ptr.vmem [resolvable:$true] %s31_s25 }
   0x5   :  { %s773_s26 = scalar_lea.vmem %s32_s25, 512  ;;  %p778_p1 = scmp.lt.s32.totalorder %s32_s25, %s32_s25 }
   0x6   :  { %p774_p0 = scmp.ne.s32.totalorder %s32_s25, %s773_s26  ;;  %p779_p2 = scmp.lt.s32.totalorder %s773_s26, %s773_s26 }
   0x8   :  { %p780_p3 = por %p779_p2, %p778_p1 }
   0xa   :  { %p781_p4 = pnand %p780_p3, %p774_p0 }
   0xc   :  { %784 = shalt.err (!%p781_p4)
}
   0xd   :  { %s874_s27 = smov 128   ;;  %s875_s28 = smov 8  }
   0xe   :  { %37 = dma.hbm_to_vmem [thread:$0]  %s948_s1, 512, %s32_s25, [#allocation6], %s874_s27, %s874_s27, %s875_s28  }
   0xf   :  { %s876_s8 = smov [#allocation2]   ;;  %s877_s10 = smov [#allocation7]  }
  0x10   :  { %s22_s9 = sshll.u32 %s876_s8, 4  ;;  %s45_s11 = sshll.u32 %s877_s10, 4  ;;  %s23_s9 = int_to_ptr.vmem [resolvable:$true] %s22_s9  ;;  %s46_s11 = int_to_ptr.vmem [resolvable:$true] %s45_s11 }
  0x11   :  { %s793_s12 = scalar_lea.vmem %s23_s9, 64  ;;  %p798_p6 = scmp.lt.s32.totalorder %s23_s9, %s23_s9 }
  0x12   :  { %p794_p5 = scmp.ne.s32.totalorder %s23_s9, %s793_s12  ;;  %p799_p7 = scmp.lt.s32.totalorder %s793_s12, %s793_s12 }
  0x14   :  { %p800_p8 = por %p799_p7, %p798_p6 }
  0x16   :  { %p801_p9 = pnand %p800_p8, %p794_p5 }
  0x18   :  { %804 = shalt.err (!%p801_p9)
}
  0x19   :  { %25 = dma.hbm_to_vmem [thread:$0]  %s947_s0, 64, %s23_s9, [#allocation3]  }
  0x1a   :  { %s813_s15 = scalar_lea.vmem %s46_s11, 4096  ;;  %p818_p11 = scmp.lt.s32.totalorder %s46_s11, %s46_s11 }
  0x1b   :  { %p814_p10 = scmp.ne.s32.totalorder %s46_s11, %s813_s15  ;;  %p819_p12 = scmp.lt.s32.totalorder %s813_s15, %s813_s15 }
  0x1d   :  { %p820_p13 = por %p819_p12, %p818_p11 }
  0x1f   :  { %p821_p0 = pnand %p820_p13, %p814_p10 }
  0x21   :  { %824 = shalt.err (!%p821_p0)
}
  0x22   :  { %51 = dma.hbm_to_vmem [thread:$0]  %s950_s3, 4096, %s46_s11, [#allocation6], %s874_s27, %s874_s27, %s875_s28  }
  0x23   :  { %s878_s17 = smov [#allocation8]  }
  0x24   :  { %s59_s18 = sshll.u32 %s878_s17, 4  ;;  %s60_s18 = int_to_ptr.vmem [resolvable:$true] %s59_s18 }
  0x25   :  { %s833_s19 = scalar_lea.vmem %s60_s18, 2048  ;;  %p838_p2 = scmp.lt.s32.totalorder %s60_s18, %s60_s18 }
  0x26   :  { %p834_p1 = scmp.ne.s32.totalorder %s60_s18, %s833_s19  ;;  %p839_p3 = scmp.lt.s32.totalorder %s833_s19, %s833_s19 }
  0x28   :  { %p840_p4 = por %p839_p3, %p838_p2 }
  0x2a   :  { %p841_p5 = pnand %p840_p4, %p834_p1 }
  0x2c   :  { %844 = shalt.err (!%p841_p5)
}
  0x2d   :  { %s879_s0 = smov 64   ;;  %s880_s20 = smov 4  }
  0x2e   :  { %65 = dma.hbm_to_vmem [thread:$0]  %s952_s5, 2048, %s60_s18, [#allocation9], %s879_s0, %s879_s0, %s880_s20  }
  0x2f   :  { %865 = dma.done.wait [#allocation3], 64  }
  0x30   :  { %866 = vsyncadd [#allocation3], 4294967232 }
  0x31   :  { %867 = dma.done.wait [#allocation6], 4608  }
  0x32   :  { %868 = vsyncadd [#allocation6], 4294962688 }
  0x33   :  { %869 = dma.done.wait [#allocation9], 2048  }
  0x34   :  { %870 = vsyncadd [#allocation9], 4294965248  ;;  %v881_v0 = vmov 0   ;;  %v695_v1 = vld [vmem:[#allocation5 + $0x14] ss:$8 sps:$4 sm:$0xff]   ;;  %vm118_vm0 = vcmask 261120   ;;  %v88_v50 = vlaneseq }
  0x35   :  { %154 = vmatprep.mubr.bf16.mxu0 %v881_v0  ;;  %v697_v2 = vld [vmem:[#allocation5 + $0x10] ss:$8 sps:$4 sm:$0xff]   ;;  %134 = vmatprep.subr.bf16.mxu0 %v695_v1  ;;  %v698_v3 = vld [vmem:[#allocation5 + $0x4] ss:$8 sps:$4 sm:$0xff]   ;;  %v700_v4 = vld [vmem:[#allocation5] ss:$8 sps:$4 sm:$0xff]  }
  0x36   :  { %135 = vmatpush1.bf16.msra.mxu0 %v697_v2  ;;  %v701_v5 = vld [vmem:[#allocation7 + $0x74] ss:$8 sps:$4 sm:$0xff]   ;;  %v703_v6 = vld [vmem:[#allocation7 + $0x70] ss:$8 sps:$4 sm:$0xff]   ;;  %v704_v7 = vld [vmem:[#allocation7 + $0x64] ss:$8 sps:$4 sm:$0xff]  }
  0x37   :  { %136 = vmatprep.subr.bf16.mxu0 %v698_v3  ;;  %371 = vmatprep.subr.bf16.mxu1 %v701_v5  ;;  %v81_v8 = vld [vmem:[#allocation2] sm:$0xf]  ;;  %v706_v9 = vld [vmem:[#allocation7 + $0x60] ss:$8 sps:$4 sm:$0xff]   ;;  %v709_v11 = vld [vmem:[#allocation7 + $0x50] ss:$8 sps:$4 sm:$0xff]  }
  0x38   :  { %372 = vmatpush1.bf16.msra.mxu1 %v703_v6  ;;  %v707_v10 = vld [vmem:[#allocation7 + $0x54] ss:$8 sps:$4 sm:$0xff]   ;;  %v710_v12 = vld [vmem:[#allocation7 + $0x44] ss:$8 sps:$4 sm:$0xff]   ;;  %v712_v13 = vld [vmem:[#allocation7 + $0x40] ss:$8 sps:$4 sm:$0xff]  }
  0x39   :  { %373 = vmatprep.subr.bf16.mxu1 %v704_v7  ;;  %v713_v14 = vld [vmem:[#allocation7 + $0x34] ss:$8 sps:$4 sm:$0xff]   ;;  %v715_v15 = vld [vmem:[#allocation7 + $0x30] ss:$8 sps:$4 sm:$0xff]   ;;  %v716_v16 = vld [vmem:[#allocation7 + $0x24] ss:$8 sps:$4 sm:$0xff]  }
  0x3a   :  { %137 = vmatpush1.bf16.msra.mxu0 %v700_v4  ;;  %v718_v17 = vld [vmem:[#allocation7 + $0x20] ss:$8 sps:$4 sm:$0xff]   ;;  %v719_v18 = vld [vmem:[#allocation7 + $0x14] ss:$8 sps:$4 sm:$0xff]   ;;  %v721_v19 = vld [vmem:[#allocation7 + $0x10] ss:$8 sps:$4 sm:$0xff]  }
  0x3b   :  { %v722_v20 = vld [vmem:[#allocation7 + $0x4] ss:$8 sps:$4 sm:$0xff]   ;;  %v724_v21 = vld [vmem:[#allocation7] ss:$8 sps:$4 sm:$0xff]   ;;  %v725_v22 = vld [vmem:[#allocation7 + $0xf4] ss:$8 sps:$4 sm:$0xff]  }
  0x3c   :  { %374 = vmatpush1.bf16.msra.mxu1 %v706_v9  ;;  %v727_v23 = vld [vmem:[#allocation7 + $0xf0] ss:$8 sps:$4 sm:$0xff]   ;;  %v728_v24 = vld [vmem:[#allocation7 + $0xe4] ss:$8 sps:$4 sm:$0xff]   ;;  %v730_v25 = vld [vmem:[#allocation7 + $0xe0] ss:$8 sps:$4 sm:$0xff]  }
  0x3d   :  { %613 = vmatmul.mubr.msk.bf16.vlgmr.msra.gmra.mxu0 %vm118_vm0, %v81_v8  ;;  %375 = vmatprep.subr.bf16.mxu1 %v707_v10  ;;  %v731_v26 = vld [vmem:[#allocation7 + $0xd4] ss:$8 sps:$4 sm:$0xff]   ;;  %v733_v27 = vld [vmem:[#allocation7 + $0xd0] ss:$8 sps:$4 sm:$0xff]   ;;  %v734_v28 = vld [vmem:[#allocation7 + $0xc4] ss:$8 sps:$4 sm:$0xff]  }
  0x3e   :  { %v736_v29 = vld [vmem:[#allocation7 + $0xc0] ss:$8 sps:$4 sm:$0xff]   ;;  %v737_v30 = vld [vmem:[#allocation7 + $0xb4] ss:$8 sps:$4 sm:$0xff]   ;;  %v739_v31 = vld [vmem:[#allocation7 + $0xb0] ss:$8 sps:$4 sm:$0xff]  }
  0x3f   :  { %v740_v32 = vld [vmem:[#allocation7 + $0xa4] ss:$8 sps:$4 sm:$0xff]   ;;  %v742_v33 = vld [vmem:[#allocation7 + $0xa0] ss:$8 sps:$4 sm:$0xff]   ;;  %v743_v34 = vld [vmem:[#allocation7 + $0x94] ss:$8 sps:$4 sm:$0xff]  }
  0x40   :  { %376 = vmatpush1.bf16.msra.mxu1 %v709_v11  ;;  %v745_v35 = vld [vmem:[#allocation7 + $0x90] ss:$8 sps:$4 sm:$0xff]   ;;  %v746_v36 = vld [vmem:[#allocation7 + $0x84] ss:$8 sps:$4 sm:$0xff]   ;;  %v748_v37 = vld [vmem:[#allocation7 + $0x80] ss:$8 sps:$4 sm:$0xff]  }
  0x41   :  { %377 = vmatprep.subr.bf16.mxu1 %v710_v12  ;;  %v749_v38 = vld [vmem:[#allocation8 + $0x78] sm:$0xff]   ;;  %v751_v40 = vld [vmem:[#allocation8 + $0x70] sm:$0xff]   ;;  %v753_v42 = vld [vmem:[#allocation8 + $0x68] sm:$0xff]   ;;  %v89_v51 = vshrl.u32 %v88_v50, 7 }
  0x42   :  { %v750_v39 = vld [vmem:[#allocation8 + $0x38] sm:$0xff]   ;;  %663 = vmatprep.subr.bf16.mxu0 %v749_v38  ;;  %v752_v41 = vld [vmem:[#allocation8 + $0x30] sm:$0xff]   ;;  %v754_v43 = vld [vmem:[#allocation8 + $0x28] sm:$0xff]  }
  0x43   :  { %664 = vmatpush3.bf16.msra.mxu0 %v750_v39  ;;  %v755_v44 = vld [vmem:[#allocation8 + $0x60] sm:$0xff]   ;;  %v757_v46 = vld [vmem:[#allocation8 + $0x58] sm:$0xff]   ;;  %v759_v48 = vld [vmem:[#allocation8 + $0x50] sm:$0xff]   ;;  %v90_v52 = vsub.s32 0, %v89_v51  ;;  %v94_v54 = vsub.s32 1, %v89_v51 }
  0x44   :  { %378 = vmatpush1.bf16.msra.mxu1 %v712_v13  ;;  %665 = vmatprep.subr.bf16.mxu0 %v751_v40  ;;  %v756_v45 = vld [vmem:[#allocation8 + $0x20] sm:$0xff]   ;;  %v758_v47 = vld [vmem:[#allocation8 + $0x18] sm:$0xff]   ;;  %v760_v49 = vld [vmem:[#allocation8 + $0x10] sm:$0xff]  }
  0x45   :  { %379 = vmatprep.subr.bf16.mxu1 %v713_v14  ;;  %v86_v53 = vld [vmem:[%s949_s2] sm:$0x3]  ;;  %v761_v3 = vld [vmem:[#allocation8 + $0x48] sm:$0xff]   ;;  %v763_v5 = vld [vmem:[#allocation8 + $0x40] sm:$0xff]  }
  0x46   :  { %v91_v55 = vrot.slane %v86_v53, %v90_v52  ;;  %v95_v56 = vrot.slane %v86_v53, %v94_v54  ;;  %v762_v4 = vld [vmem:[#allocation8 + $0x8] sm:$0xff]   ;;  %v764_v6 = vld [vmem:[#allocation8] sm:$0xff]   ;;  %v199_v7 = vld [vmem:[%s951_s4] sm:$0x3]  ;;  %s882_s4 = smov [#allocation10]  }
  0x47   :  { %666 = vmatpush3.bf16.msra.mxu0 %v752_v41  ;;  %v204_v8 = vrot.slane %v199_v7, %v90_v52  ;;  %v208_v9 = vrot.slane %v199_v7, %v94_v54  ;;  %s598_s26 = sshll.u32 %s882_s4, 4  ;;  %s599_s26 = int_to_ptr.vmem [resolvable:$true] %s598_s26 }
  0x48   :  { %380 = vmatpush1.bf16.msra.mxu1 %v715_v15  ;;  %667 = vmatprep.subr.bf16.mxu0 %v753_v42  ;;  %s845_s27 = scalar_lea.vmem %s599_s26, 128  ;;  %p850_p7 = scmp.lt.s32.totalorder %s599_s26, %s599_s26 }
  0x49   :  { %381 = vmatprep.subr.bf16.mxu1 %v716_v16  ;;  %p846_p6 = scmp.ne.s32.totalorder %s599_s26, %s845_s27  ;;  %p851_p8 = scmp.lt.s32.totalorder %s845_s27, %s845_s27 }
  0x4b   :  { %668 = vmatpush3.bf16.msra.mxu0 %v754_v43  ;;  %p852_p9 = por %p851_p8, %p850_p7 }
  0x4c   :  { %382 = vmatpush1.bf16.msra.mxu1 %v718_v17  ;;  %669 = vmatprep.subr.bf16.mxu0 %v755_v44 }
  0x4d   :  { %383 = vmatprep.subr.bf16.mxu1 %v719_v18  ;;  %p853_p10 = pnand %p852_p9, %p846_p6 }
  0x4f   :  { %670 = vmatpush3.bf16.msra.mxu0 %v756_v45 }
  0x50   :  { %384 = vmatpush1.bf16.msra.mxu1 %v721_v19  ;;  %671 = vmatprep.subr.bf16.mxu0 %v757_v46 }
  0x51   :  { %385 = vmatprep.subr.bf16.mxu1 %v722_v20 }
  0x53   :  { %672 = vmatpush3.bf16.msra.mxu0 %v758_v47 }
  0x54   :  { %386 = vmatpush1.bf16.msra.mxu1 %v724_v21  ;;  %673 = vmatprep.subr.bf16.mxu0 %v759_v48  ;;  %v646_v21 = vld [vmem:[%s953_s6] ss:$0 sm:$0xff] }
  0x55   :  { %387 = vmatprep.subr.bf16.mxu1 %v725_v22 }
  0x57   :  { %674 = vmatpush3.bf16.msra.mxu0 %v760_v49 }
  0x58   :  { %388 = vmatpush2.bf16.msra.mxu1 %v727_v23  ;;  %675 = vmatprep.subr.bf16.mxu0 %v761_v3 }
  0x59   :  { %389 = vmatprep.subr.bf16.mxu1 %v728_v24 }
  0x5b   :  { %676 = vmatpush3.bf16.msra.mxu0 %v762_v4 }
  0x5c   :  { %390 = vmatpush2.bf16.msra.mxu1 %v730_v25  ;;  %677 = vmatprep.subr.bf16.mxu0 %v763_v5 }
  0x5d   :  { %391 = vmatprep.subr.bf16.mxu1 %v731_v26 }
  0x5f   :  { %678 = vmatpush3.bf16.msra.mxu0 %v764_v6 }
  0x60   :  { %392 = vmatpush2.bf16.msra.mxu1 %v733_v27 }
  0x61   :  { %393 = vmatprep.subr.bf16.mxu1 %v734_v28 }
  0x64   :  { %394 = vmatpush2.bf16.msra.mxu1 %v736_v29 }
  0x65   :  { %395 = vmatprep.subr.bf16.mxu1 %v737_v30 }
  0x68   :  { %396 = vmatpush2.bf16.msra.mxu1 %v739_v31 }
  0x69   :  { %397 = vmatprep.subr.bf16.mxu1 %v740_v32 }
  0x6c   :  { %398 = vmatpush2.bf16.msra.mxu1 %v742_v33 }
  0x6d   :  { %399 = vmatprep.subr.bf16.mxu1 %v743_v34 }
  0x70   :  { %400 = vmatpush2.bf16.msra.mxu1 %v745_v35 }
  0x71   :  { %401 = vmatprep.subr.bf16.mxu1 %v746_v36 }
  0x74   :  { %402 = vmatpush2.bf16.msra.mxu1 %v748_v37 }
  0xfd   :  { %v156_v57 = vpop.f32.mrf.mxu0 }
  0xfe   :  { %v157_v58 = vadd.f32 %v156_v57, %v91_v55 }
  0xff   :  { %v158_v59 = vpop.f32.mrf.mxu0 }
 0x100   :  { %v159_v60 = vadd.f32 %v158_v59, %v95_v56  ;;  %v163_v61 = vmax.f32 %v157_v58, 0.0 }
 0x101   :  { %v160_v62 = vpop.f32.mrf.mxu0 }
 0x102   :  { %v164_v63 = vmax.f32 %v159_v60, 0.0  ;;  %v165_v2 = vpack.c.bf16 %v163_v61, %v163_v61 }
 0x103   :  { %v161_v0 = vpop.f32.mrf.mxu0 }
 0x104   :  { %v166_v1 = vpack.c.bf16 %v164_v63, %v164_v63 }
 0x106   :  { %403 = vmatprep.mubr.bf16.mxu1 %v166_v1 }
 0x107   :  { %404 = vmatmul.mubr.bf16.vlgmr.msra.gmra.mxu1 %v165_v2 }
 0x1c7   :  { %v405_v10 = vpop.f32.mrf.mxu1 }
 0x1c8   :  { %v406_v11 = vadd.f32 %v405_v10, %v204_v8 }
 0x1c9   :  { %v407_v12 = vpop.f32.mrf.mxu1 }
 0x1ca   :  { %v408_v13 = vadd.f32 %v407_v12, %v208_v9  ;;  %v412_v14 = vmax.f32 %v406_v11, 0.0 }
 0x1cb   :  { %v409_v15 = vpop.f32.mrf.mxu1 }
 0x1cc   :  { %v413_v16 = vmax.f32 %v408_v13, 0.0  ;;  %v414_v19 = vpack.c.bf16 %v412_v14, %v412_v14 }
 0x1cd   :  { %v410_v17 = vpop.f32.mrf.mxu1 }
 0x1ce   :  { %v415_v18 = vpack.c.bf16 %v413_v16, %v413_v16 }
 0x1d0   :  { %583 = vmatprep.mubr.bf16.mxu0 %v415_v18 }
 0x1d1   :  { %584 = vmatmul.mubr.bf16.vlgmr.msra.gmra.mxu0 %v414_v19 }
 0x291   :  { %v679_v20 = vpop.f32.mrf.mxu0 }
 0x293   :  { %v680_v22 = vpop.f32.mrf.mxu0 }
 0x294   :  { %v681_v23 = vadd.f32 %v680_v22, %v679_v20 }
 0x295   :  { %v682_v24 = vpop.f32.mrf.mxu0 }
 0x296   :  { %v586_v25 = vadd.f32 %v681_v23, %v646_v21 }
 0x297   :  { %v683_v26 = vpop.f32.mrf.mxu0 }
 0x298   :  { %591 = vst [vmem:[#allocation10] sm:$0xff] %v586_v25 }
 0x299   :  { %856 = shalt.err (!%p853_p10)
}
 0x29a   :  { %601 = dma.vmem_to_hbm [thread:$0]  %s599_s26, 128, %s954_s7, [#allocation4]  }
 0x29b   :  { %871 = dma.done.wait [#allocation4], 128  }
 0x29c   :  { %872 = vsyncadd [#allocation4], 4294967168 }
 0x29d   :  { %605 = vsyncpa [#allocation3], 1 }
 0x29e   :  { %606 = vsyncpa [#allocation6], 1 }
 0x29f   :  { %607 = vsyncpa [#allocation9], 1 }
 0x2a0   :  { %608 = vsyncpa [#allocation4], 1 }

</bundles_post_ra>
